<compile_context>
chip_gen: v7x
topology: tpu7x:2x2x1
jax: 0.10.0
libtpu: 0.0.40
codegen_flags: <defaults>
</compile_context>

<pallas_src>
import jax
import jax.numpy as jnp
from jax.experimental import pallas as pl
from jax.experimental.pallas import tpu as pltpu


def _posenc_kernel(x_ref, pos_ref, cls_ref, o_ref):
    # x_ref:   (tB, S,   E)  input tokens
    # pos_ref: (1,  S+1, E)  positional embedding (row 0 = cls position)
    # cls_ref: (1,  1,   E)  cls token
    # o_ref:   (tB, S+1, E)  output = concat([cls, x], axis=1) + pos
    tB = o_ref.shape[0]
    E = o_ref.shape[2]
    # cls row (tiny), broadcast over the batch tile.
    cls_row = (cls_ref[...] + pos_ref[:, 0:1, :]).astype(o_ref.dtype)      # (1,1,E)
    o_ref[:, 0:1, :] = jnp.broadcast_to(cls_row, (tB, 1, E))
    # body: aligned x read, sublane-offset (in-VMEM) store into rows 1..S.
    o_ref[:, 1:, :] = (x_ref[...] + pos_ref[:, 1:, :]).astype(o_ref.dtype)


# Double-buffered VMEM footprint budget (fits comfortably under the 64 MiB
# physical VMEM of v7x and well under v5e/v6e's 128 MiB).
_VMEM_BUDGET_BYTES = 40 << 20


def _choose_batch_tile(B, per_batch_bytes, fixed_bytes, budget_bytes):
    """Largest divisor of B whose double-buffered footprint fits the budget,
    preferring >=2 (and even) grid steps so v7x's two TensorCores both work."""
    best, best_key = None, None
    for tb in range(1, B + 1):
        if B % tb:
            continue
        footprint = 2 * tb * per_batch_bytes + fixed_bytes
        if footprint > budget_bytes:
            continue
        steps = B // tb
        key = (
            1 if (steps >= 2 or B == 1) else 0,          # give both v7x TCs work
            1 if (steps % 2 == 0 or steps == 1) else 0,  # even split across 2 TCs
            tb,                                          # otherwise: biggest block
        )
        if best_key is None or key > best_key:
            best_key, best = key, (tb, footprint)
    return best  # None if even tB == 1 does not fit


def positional_encoding(x, cls_token, pos_embeddings):
    """x: (B, S, E); cls_token: (1, 1, E); pos_embeddings: (1, max_seq_len+1, E)."""
    B, S, E = x.shape
    assert cls_token.shape == (1, 1, E)
    assert pos_embeddings.shape[0] == 1 and pos_embeddings.shape[2] == E
    assert pos_embeddings.shape[1] >= S + 1

    out_dtype = jnp.result_type(x.dtype, cls_token.dtype, pos_embeddings.dtype)
    pos = pos_embeddings[:, : S + 1, :]   # rows actually used; keep param dtype

    x_item = jnp.dtype(x.dtype).itemsize
    pos_item = jnp.dtype(pos.dtype).itemsize
    cls_item = jnp.dtype(cls_token.dtype).itemsize
    out_item = jnp.dtype(out_dtype).itemsize

    per_batch_bytes = S * E * x_item + (S + 1) * E * out_item
    fixed_bytes = 2 * ((S + 1) * E * pos_item + E * cls_item)

    picked = _choose_batch_tile(B, per_batch_bytes, fixed_bytes, _VMEM_BUDGET_BYTES)
    if picked is None:
        # TODO(synk): seq-tiled concat-free kernel for extremely long sequences;
        # plain-XLA fallback keeps correctness for this rare case.
        cls_full = jnp.broadcast_to(cls_token.astype(out_dtype), (B, 1, E))
        y = jnp.concatenate([cls_full, x.astype(out_dtype)], axis=1)
        return y + pos.astype(out_dtype)

    tB, footprint = picked
    vmem_limit = int(max(footprint + (4 << 20), 32 << 20))

    out = pl.pallas_call(
        _posenc_kernel,
        out_shape=jax.ShapeDtypeStruct((B, S + 1, E), out_dtype),
        grid_spec=pltpu.PrefetchScalarGridSpec(
            num_scalar_prefetch=0,
            grid=(pl.cdiv(B, tB),),
            in_specs=[
                pl.BlockSpec((tB, S, E), lambda b: (b, 0, 0)),      # x
                pl.BlockSpec((1, S + 1, E), lambda b: (0, 0, 0)),   # pos (resident)
                pl.BlockSpec((1, 1, E), lambda b: (0, 0, 0)),       # cls (resident)
            ],
            out_specs=pl.BlockSpec((tB, S + 1, E), lambda b: (b, 0, 0)),
        ),
        compiler_params=pltpu.CompilerParams(
            dimension_semantics=("parallel",),
            vmem_limit_bytes=vmem_limit,
        ),
        # Pure bandwidth-bound: read x + pos + cls, write out once.
        cost_estimate=pl.CostEstimate(
            flops=B * (S + 1) * E,
            transcendentals=0,
            bytes_accessed=(
                B * S * E * x_item
                + (S + 1) * E * pos_item
                + E * cls_item
                + B * (S + 1) * E * out_item
            ),
        ),
    )(x, pos, cls_token)

    # TODO(synk): dropout is identity here (eval mode).
    return out


def _reference(x, cls_token, pos_embeddings):
    B, S, E = x.shape
    out_dtype = jnp.result_type(x.dtype, cls_token.dtype, pos_embeddings.dtype)
    pos = pos_embeddings[:, : S + 1, :].astype(out_dtype)
    cls = jnp.broadcast_to(cls_token.astype(out_dtype), (B, 1, E))
    y = jnp.concatenate([cls, x.astype(out_dtype)], axis=1)
    return y + pos


if __name__ == "__main__":
    key = jax.random.PRNGKey(0)
    k_x, k_cls, k_pos, k_x2, k_cls2, k_pos2 = jax.random.split(key, 6)

    # Case 1: small demo shapes (batch=2, seq=8, embed=32), max_seq_len == seq_len.
    B, S, E = 2, 8, 32
    x = jax.random.normal(k_x, (B, S, E), dtype=jnp.float32)
    cls_token = jax.random.normal(k_cls, (1, 1, E), dtype=jnp.float32)
    pos_embeddings = jax.random.normal(k_pos, (1, S + 1, E), dtype=jnp.float32)

    out = jax.block_until_ready(positional_encoding(x, cls_token, pos_embeddings))
    ref = _reference(x, cls_token, pos_embeddings)
    assert out.shape == (B, S + 1, E), out.shape
    assert jnp.allclose(out, ref, atol=1e-6, rtol=1e-6), "case 1 mismatch vs reference"

    # Case 2: lane-aligned embed (E % 128 == 0) with a multi-step batch grid.
    B2, S2, E2 = 8, 16, 128
    x2 = jax.random.normal(k_x2, (B2, S2, E2), dtype=jnp.float32)
    cls2 = jax.random.normal(k_cls2, (1, 1, E2), dtype=jnp.float32)
    pos2 = jax.random.normal(k_pos2, (1, S2 + 1, E2), dtype=jnp.float32)

    out2 = jax.block_until_ready(positional_encoding(x2, cls2, pos2))
    ref2 = _reference(x2, cls2, pos2)
    assert out2.shape == (B2, S2 + 1, E2), out2.shape
    assert jnp.allclose(out2, ref2, atol=1e-6, rtol=1e-6), "case 2 mismatch vs reference"

    print("KERNEL_OK")
</pallas_src>

<mosaic_0001>
module attributes {stable_mosaic.version = 11 : i64} {
  func.func @_posenc_kernel(%arg0: i32, %arg1: memref<1x8x32xf32, #tpu.memory_space<vmem>>, %arg2: memref<1x9x32xf32, #tpu.memory_space<vmem>>, %arg3: memref<1x1x32xf32, #tpu.memory_space<vmem>>, %arg4: memref<1x9x32xf32, #tpu.memory_space<vmem>>) attributes {dimension_semantics = [#tpu.dimension_semantics<parallel>], iteration_bounds = array<i64: 2>, scalar_prefetch = 0 : i64, scratch_operands = 0 : i64, tpu.core_type = #tpu.core_type<tc>, window_params = [{transform_indices = @transform_0, window_bounds = array<i64: 1, 8, 32>}, {pipeline_mode = #tpu.pipeline_mode<synchronous>, transform_indices = @transform_1, window_bounds = array<i64: 1, 9, 32>}, {pipeline_mode = #tpu.pipeline_mode<synchronous>, transform_indices = @transform_2, window_bounds = array<i64: 1, 1, 32>}, {transform_indices = @transform_3, window_bounds = array<i64: 1, 9, 32>}]} {
    %c0 = arith.constant 0 : index
    %c0_0 = arith.constant 0 : index
    %c0_1 = arith.constant 0 : index
    %0 = vector.load %arg3[%c0, %c0_0, %c0_1] : memref<1x1x32xf32, #tpu.memory_space<vmem>>, vector<1x1x32xf32>
    %c0_2 = arith.constant 0 : index
    %c0_3 = arith.constant 0 : index
    %c0_4 = arith.constant 0 : index
    %1 = vector.load %arg2[%c0_2, %c0_3, %c0_4] : memref<1x9x32xf32, #tpu.memory_space<vmem>>, vector<1x1x32xf32>
    %2 = arith.addf %0, %1 : vector<1x1x32xf32>
    %c0_5 = arith.constant 0 : index
    %c0_6 = arith.constant 0 : index
    %c0_7 = arith.constant 0 : index
    %3 = vector.load %arg4[%c0_5, %c0_6, %c0_7] : memref<1x9x32xf32, #tpu.memory_space<vmem>>, vector<1x1x32xf32>
    tpu.vector_store %arg4[%c0_5, %c0_6, %c0_7], %2 {strides = array<i32>} : memref<1x9x32xf32, #tpu.memory_space<vmem>>, vector<1x1x32xf32>,
    %c0_8 = arith.constant 0 : index
    %c0_9 = arith.constant 0 : index
    %c0_10 = arith.constant 0 : index
    %4 = vector.load %arg1[%c0_8, %c0_9, %c0_10] : memref<1x8x32xf32, #tpu.memory_space<vmem>>, vector<1x8x32xf32>
    %c0_11 = arith.constant 0 : index
    %c1 = arith.constant 1 : index
    %c0_12 = arith.constant 0 : index
    %5 = vector.load %arg2[%c0_11, %c1, %c0_12] : memref<1x9x32xf32, #tpu.memory_space<vmem>>, vector<1x8x32xf32>
    %6 = arith.addf %4, %5 : vector<1x8x32xf32>
    %c0_13 = arith.constant 0 : index
    %c1_14 = arith.constant 1 : index
    %c0_15 = arith.constant 0 : index
    %7 = vector.load %arg4[%c0_13, %c1_14, %c0_15] : memref<1x9x32xf32, #tpu.memory_space<vmem>>, vector<1x8x32xf32>
    tpu.vector_store %arg4[%c0_13, %c1_14, %c0_15], %6 {strides = array<i32>} : memref<1x9x32xf32, #tpu.memory_space<vmem>>, vector<1x8x32xf32>,
    return
  }
  func.func @transform_0(%arg0: i32) -> (i32, i32, i32) {
    %c0_i32 = arith.constant 0 : i32
    %c0_i32_0 = arith.constant 0 : i32
    %c0_i32_1 = arith.constant 0 : i32
    return %arg0, %c0_i32, %c0_i32_0 : i32, i32, i32
  }
  func.func @transform_1(%arg0: i32) -> (i32, i32, i32) {
    %c0_i32 = arith.constant 0 : i32
    %c0_i32_0 = arith.constant 0 : i32
    %c0_i32_1 = arith.constant 0 : i32
    %c0_i32_2 = arith.constant 0 : i32
    return %c0_i32, %c0_i32_0, %c0_i32_1 : i32, i32, i32
  }
  func.func @transform_2(%arg0: i32) -> (i32, i32, i32) {
    %c0_i32 = arith.constant 0 : i32
    %c0_i32_0 = arith.constant 0 : i32
    %c0_i32_1 = arith.constant 0 : i32
    %c0_i32_2 = arith.constant 0 : i32
    return %c0_i32, %c0_i32_0, %c0_i32_1 : i32, i32, i32
  }
  func.func @transform_3(%arg0: i32) -> (i32, i32, i32) {
    %c0_i32 = arith.constant 0 : i32
    %c0_i32_0 = arith.constant 0 : i32
    %c0_i32_1 = arith.constant 0 : i32
    return %arg0, %c0_i32, %c0_i32_0 : i32, i32, i32
  }
}

</mosaic_0001>

<bundles_post_ra>
// kernel: tpu_custom_call.1
= control target key start
LH: loop header
LB: loop body
LE: loop exit
PB: predicated region body
PF: predicated region fallthrough
CT: control target
= control target key end

     0   :  { %s256_s12 = smov 0   ;;  %s295_s0 = inlined_call_operand.vmem [shape: f32[2,8,32], index: 0, kind: input, shape index: {}]   ;;  %s296_s1 = inlined_call_operand.vmem [shape: f32[1,9,32], index: 1, kind: input, shape index: {}]   ;;  %s297_s2 = inlined_call_operand.vmem [shape: f32[1,1,32], index: 2, kind: input, shape index: {}]   ;;  %s298_s3 = inlined_call_operand.vmem [shape: f32[2,9,32], index: 3, kind: output, shape index: {}]  }
   0x1 LB: > { %s233_s13 = sadd.s32 4294967295, %s258_s12   ;;  %p237_p0 = scmp.ge.s32.totalorder %s258_s12, 1  ;;  %s258_s12 = sphi %s256_s12, %s13_s12  }
   0x2   : > { %p136_p1 = scmp.lt.s32.totalorder %s258_s12, 3 }
   0x4   : > { %p137_p2 = pnand %p237_p0, %p136_p1 }
   0x5   : > { %p159_p3 = scmp.lt.s32.totalorder (!%p137_p2), %s233_s13, 1  ;;  %v168_v0 = vld [vmem:[%s297_s2] sm:$0x1] (!%p137_p2)  ;;  %vm171_vm0 = vcmask (!%p137_p2), 253952   ;;  %v174_v3 = vld [vmem:[%s296_s1 + $0x1] sm:$0xff] (!%p137_p2)  ;;  %vm176_vm1 = vcmask (!%p137_p2), 261120  }
   0x6   : > { %140 = sbr.rel (%p137_p2) target bundleno = 20 (0x14), region = 32  ;;  %v169_v1 = vld [vmem:[%s296_s1] sm:$0x1] (!%p137_p2) }
   0x7   : > { %v170_v2 = vadd.f32 (!%p137_p2), %v169_v1, %v168_v0 }
   0xd   : > { %s300_s13 = smov (!%p159_p3, %s233_s13), 1 }
   0xe   : > { %s243_s18 = sshll.u32 %s300_s13, 4  ;;  %s238_s19 = sshll.u32 %s300_s13, 3 }
   0xf   : > { %s167_s24 = scalar_lea.vmem %s298_s3, %s243_s18  ;;  %s162_s27 = scalar_lea.vmem %s295_s0, %s238_s19 }
  0x10   : > { %172 = vst.msk [vmem:[%s167_s24] sm:$0x1] %vm171_vm0, %v170_v2  ;;  %v173_v4 = vld [vmem:[%s162_s27] sm:$0xff] }
  0x11   : > { %v175_v5 = vadd.f32 %v174_v3, %v173_v4 }
  0x13   : > { %177 = vst.msk [vmem:[%s167_s24 + $0x1] sm:$0xff] %vm176_vm1, %v175_v5 }
  0x14 PF: > { %s13_s12 = sadd.s32 1, %s258_s12  }
  0x15   : > { %p10_p4 = scmp.ge.s32.totalorder %s13_s12, 4  }
  0x17   :  { %12 = sbr.rel (!%p10_p4) target bundleno = 1 (0x1), region = 62 }

</bundles_post_ra>
